<compile_context>
chip_gen: v7x
topology: tpu7x:2x2x1
jax: 0.10.0
libtpu: 0.0.40
codegen_flags: <defaults>
</compile_context>

<pallas_src>
import jax
import jax.numpy as jnp
from jax.experimental import pallas as pl
from jax.experimental.pallas import tpu as pltpu


# ---------------------------------------------------------------------------
# Table construction (hoisted out of the per-call path).
# ---------------------------------------------------------------------------
def make_rope_tables_raw(d_model: int, max_len: int = 5000):
    """Half-width sin/cos tables, exactly like the PyTorch module's parameters."""
    assert d_model % 2 == 0, "d_model must be even for ROPE."
    inv_freq = 1.0 / (10000.0 ** (jnp.arange(0, d_model, 2, dtype=jnp.float32) / d_model))
    positions = jnp.arange(0, max_len, dtype=jnp.float32)
    ang = jnp.einsum("i,j->ij", positions, inv_freq)  # (max_len, d_model//2)
    return jnp.sin(ang), jnp.cos(ang)


def make_rope_tables(d_model: int, max_len: int = 5000, dtype=jnp.float32):
    """Full-width tables consumed by the kernel.

    cos_full[:, 2k] = cos_full[:, 2k+1] = cos_k
    sin_alt [:, 2k] = -sin_k,  sin_alt[:, 2k+1] = +sin_k   (sign folded in)
    For bf16 activations pass dtype=jnp.bfloat16 to halve table HBM traffic.
    """
    sin_half, cos_half = make_rope_tables_raw(d_model, max_len)
    cos_full = jnp.repeat(cos_half, repeats=2, axis=-1)                      # (max_len, D)
    sin_alt = jnp.stack([-sin_half, sin_half], axis=-1).reshape(max_len, d_model)
    return cos_full.astype(dtype), sin_alt.astype(dtype)


# ---------------------------------------------------------------------------
# Kernel.
# ---------------------------------------------------------------------------
def _rope_kernel(x_ref, cos_ref, sin_ref, o_ref):
    # x_ref: (1, TS, L) tile of the (flattened) input; cos/sin_ref: (TS, L), shared
    # across the batch axis (their block index does not depend on batch -> DMA skipped).
    x = x_ref[...]                      # native dtype (bf16 stays bf16 on v6e/v7x)
    cos = cos_ref[...][None]
    sin = sin_ref[...][None]

    lane_axis = x.ndim - 1              # pltpu.roll requires a non-negative axis
    lanes = x.shape[lane_axis]

    # swap_pairs(x): lane i gets x[i+1] at even i, x[i-1] at odd i.
    # pltpu.roll matches np.roll: result[i] = x[(i - shift) % n]; rolls run on the XLU slot.
    x_next = pltpu.roll(x, shift=lanes - 1, axis=lane_axis)   # element i <- x[i+1]
    x_prev = pltpu.roll(x, shift=1, axis=lane_axis)           # element i <- x[i-1]

    # Tiny (1, 1, lanes) parity mask; jnp.where broadcasts it across the sublane dim.
    lane = jax.lax.broadcasted_iota(jnp.int32, (1, 1, lanes), dimension=2)
    even = (lane & 1) == 0
    rot = jnp.where(even, x_next, x_prev)
    # Wrap-around lanes from the rolls are always discarded by the parity select
    # (row width is even), so flattening (seq, d_model) into wider rows stays correct.

    # Alternating sign already folded into the sin table -> no negate needed here.
    o_ref[...] = (x * cos + rot * sin).astype(o_ref.dtype)


# ---------------------------------------------------------------------------
# Wrapper: layout + tiling decisions.
# ---------------------------------------------------------------------------
def _vmem_capacity_bytes() -> int:
    """Physical VMEM per TensorCore (128 MiB v5e/v6e, 64 MiB v7x); conservative fallback."""
    try:
        cap = getattr(pltpu.get_tpu_info(), "vmem_capacity_bytes", None)
        if cap:
            return int(cap)
    except Exception:
        pass
    return 64 * 1024 * 1024


def _sublane_multiple(itemsize: int) -> int:
    """Dtype-native sublane count: 8 for f32, 16 for bf16, 32 for int8/fp8."""
    return max(8, 32 // max(1, itemsize))


def _choose_lanes(seq_len: int, d_model: int) -> int:
    """Pick a lane-dense row width (multiple of 128) for the last block dim."""
    if d_model % 128 == 0:
        return d_model
    flat = seq_len * d_model
    for lanes in (1024, 512, 256, 128):
        if flat % lanes == 0 and flat // lanes >= 8:
            return lanes
    if flat % 128 == 0:
        return 128
    # Fallback: correct, but lane-masked stores (only when S*D is not a multiple of 128).
    return d_model


def _choose_row_tile(rows_total: int, lanes: int, x_itemsize: int,
                     bytes_per_row_pipelined: int, vmem_limit_bytes: int) -> int:
    """Row-tile size from the VMEM budget.

    bytes_per_row_pipelined already includes x + out + cos + sin and double-buffering;
    target ~60% of the scoped limit so the compiler keeps full pipelining + scratch.
    """
    sub = _sublane_multiple(x_itemsize)
    ts = (vmem_limit_bytes * 6 // 10) // max(1, bytes_per_row_pipelined)
    ts = int(ts) - int(ts) % sub
    ts = max(sub, ts)
    if ts >= rows_total:
        return rows_total
    # Prefer a tile that divides rows_total exactly (no masked partial tail tile).
    for cand in range(ts, sub - 1, -sub):
        if rows_total % cand == 0:
            return cand
    return ts  # correct, but the last tile will be masked


def rope_forward(x, cos_full, sin_alt):
    """Apply RoPE.  x: (B, S, D).  cos_full / sin_alt: (max_len, D) from make_rope_tables."""
    batch, seq_len, d_model = x.shape
    assert d_model % 2 == 0, "d_model must be even for ROPE."
    assert cos_full.shape[0] >= seq_len and cos_full.shape[1] == d_model
    assert sin_alt.shape == cos_full.shape

    lanes = _choose_lanes(seq_len, d_model)
    rows_total = (seq_len * d_model) // lanes

    x_item = jnp.dtype(x.dtype).itemsize
    cos_item = jnp.dtype(cos_full.dtype).itemsize
    sin_item = jnp.dtype(sin_alt.dtype).itemsize

    # Generation-aware budgets: 64 MiB scoped limit on v5e/v6e (128 MiB phys), ~40 MiB on
    # v7x (64 MiB phys) so double-buffering never gets dropped.
    vmem_limit = min(64 * 1024 * 1024, (_vmem_capacity_bytes() * 5) // 8)

    # Per pipelined row: double-buffered x + out (x_item each) and cos + sin tables.
    bytes_per_row = 2 * lanes * (2 * x_item + cos_item + sin_item)
    ts = _choose_row_tile(rows_total, lanes, x_item, bytes_per_row, vmem_limit)
    n_row_tiles = pl.cdiv(rows_total, ts)

    # Pure-bitcast reshapes: flatten (seq, d_model) into rows of `lanes` elements so the
    # output block's last dim is a multiple of 128 (unmasked stores). Pairs never straddle
    # a row boundary because both d_model and `lanes` are even.
    x2 = x.reshape(batch, rows_total, lanes)
    cos2 = cos_full[:seq_len].reshape(rows_total, lanes)
    sin2 = sin_alt[:seq_len].reshape(rows_total, lanes)

    # batch is the fastest-varying grid axis; the table blocks' index (t, 0) is constant
    # across it, so their DMA is issued once per row tile instead of once per (tile, batch).
    # Row-tile axis is the "parallel" one -> v7x megacore shards row tiles, so each TC
    # keeps its own once-per-tile table fetch and both HBM paths are used.
    grid = (n_row_tiles, batch)

    out2 = pl.pallas_call(
        _rope_kernel,
        out_shape=jax.ShapeDtypeStruct((batch, rows_total, lanes), x.dtype),
        grid_spec=pltpu.PrefetchScalarGridSpec(
            num_scalar_prefetch=0,
            grid=grid,
            in_specs=[
                pl.BlockSpec((1, ts, lanes), lambda t, b: (b, t, 0)),
                pl.BlockSpec((ts, lanes), lambda t, b: (t, 0)),
                pl.BlockSpec((ts, lanes), lambda t, b: (t, 0)),
            ],
            out_specs=pl.BlockSpec((1, ts, lanes), lambda t, b: (b, t, 0)),
        ),
        compiler_params=pltpu.CompilerParams(
            dimension_semantics=("parallel", "arbitrary"),
            vmem_limit_bytes=vmem_limit,
        ),
        # NOTE: callers that no longer need x can additionally pass
        # input_output_aliases={0: 0} to run in place (no extra B*S*D HBM buffer).
    )(x2, cos2, sin2)

    return out2.reshape(batch, seq_len, d_model)


# ---------------------------------------------------------------------------
# Pure-JAX reference (direct port of the PyTorch forward) + test.
# ---------------------------------------------------------------------------
def rope_reference(x, sin_half, cos_half):
    batch, seq_len, d_model = x.shape
    sin_full = jnp.repeat(sin_half[:seq_len, :], repeats=2, axis=-1)[None]
    cos_full = jnp.repeat(cos_half[:seq_len, :], repeats=2, axis=-1)[None]
    x_even = -x[..., 1::2]
    x_odd = x[..., 0::2]
    rot = jnp.stack([x_even, x_odd], axis=-1).reshape(batch, seq_len, d_model)
    return x * cos_full + rot * sin_full


if __name__ == "__main__":
    d_model = 32
    max_len = 64
    batch, seq_len = 2, 8

    sin_half, cos_half = make_rope_tables_raw(d_model, max_len)
    # Tables in the activation dtype (pass jnp.bfloat16 for bf16 runs to halve traffic).
    cos_full, sin_alt = make_rope_tables(d_model, max_len, dtype=jnp.float32)

    key = jax.random.PRNGKey(0)
    x = jax.random.normal(key, (batch, seq_len, d_model), dtype=jnp.float32)

    out = jax.jit(rope_forward)(x, cos_full, sin_alt)
    out = jax.block_until_ready(out)

    ref = rope_reference(x, sin_half, cos_half)
    assert out.shape == (batch, seq_len, d_model)
    assert jnp.allclose(out, ref, atol=1e-5, rtol=1e-5), "Pallas RoPE mismatch vs reference"

    print("KERNEL_OK")
</pallas_src>

<mosaic_0001>
module attributes {stable_mosaic.version = 11 : i64} {
  func.func @_rope_kernel(%arg0: i32, %arg1: i32, %arg2: memref<1x2x128xf32, #tpu.memory_space<vmem>>, %arg3: memref<2x128xf32, #tpu.memory_space<vmem>>, %arg4: memref<2x128xf32, #tpu.memory_space<vmem>>, %arg5: memref<1x2x128xf32, #tpu.memory_space<vmem>>) attributes {dimension_semantics = [#tpu.dimension_semantics<parallel>, #tpu.dimension_semantics<arbitrary>], iteration_bounds = array<i64: 1, 2>, scalar_prefetch = 0 : i64, scratch_operands = 0 : i64, tpu.core_type = #tpu.core_type<tc>, window_params = [{transform_indices = @transform_0, window_bounds = array<i64: 1, 2, 128>}, {transform_indices = @transform_1, window_bounds = array<i64: 2, 128>}, {transform_indices = @transform_2, window_bounds = array<i64: 2, 128>}, {transform_indices = @transform_3, window_bounds = array<i64: 1, 2, 128>}]} {
    %c0 = arith.constant 0 : index
    %c0_0 = arith.constant 0 : index
    %c0_1 = arith.constant 0 : index
    %0 = vector.load %arg2[%c0, %c0_0, %c0_1] : memref<1x2x128xf32, #tpu.memory_space<vmem>>, vector<1x2x128xf32>
    %c0_2 = arith.constant 0 : index
    %c0_3 = arith.constant 0 : index
    %1 = vector.load %arg3[%c0_2, %c0_3] : memref<2x128xf32, #tpu.memory_space<vmem>>, vector<2x128xf32>
    %2 = vector.shape_cast %1 : vector<2x128xf32> to vector<1x2x128xf32>
    %c0_4 = arith.constant 0 : index
    %c0_5 = arith.constant 0 : index
    %3 = vector.load %arg4[%c0_4, %c0_5] : memref<2x128xf32, #tpu.memory_space<vmem>>, vector<2x128xf32>
    %4 = vector.shape_cast %3 : vector<2x128xf32> to vector<1x2x128xf32>
    %c127_i32 = arith.constant 127 : i32
    %5 = tpu.dynamic_rotate %0 by %c127_i32 dim 2 : vector<1x2x128xf32>, i32 -> vector<1x2x128xf32>
    %c1_i32 = arith.constant 1 : i32
    %6 = tpu.dynamic_rotate %0 by %c1_i32 dim 2 : vector<1x2x128xf32>, i32 -> vector<1x2x128xf32>
    %7 = tpu.iota {dimensions = array<i32: 2>} : vector<1x1x128xi32>
    %c1_i32_6 = arith.constant 1 : i32
    %8 = vector.broadcast %c1_i32_6 : i32 to vector<1x1x128xi32>
    %9 = arith.andi %7, %8 : vector<1x1x128xi32>
    %c0_i32 = arith.constant 0 : i32
    %10 = vector.broadcast %c0_i32 : i32 to vector<1x1x128xi32>
    %11 = arith.cmpi eq, %9, %10 : vector<1x1x128xi32>
    %12 = vector.shape_cast %11 : vector<1x1x128xi1> to vector<1x1x128xi1>
    %13 = vector.broadcast %12 : vector<1x1x128xi1> to vector<1x2x128xi1>
    %14 = arith.select %13, %5, %6 : vector<1x2x128xi1>, vector<1x2x128xf32>
    %15 = arith.mulf %0, %2 : vector<1x2x128xf32>
    %16 = arith.mulf %14, %4 : vector<1x2x128xf32>
    %17 = arith.addf %15, %16 : vector<1x2x128xf32>
    %c0_7 = arith.constant 0 : index
    %c0_8 = arith.constant 0 : index
    %c0_9 = arith.constant 0 : index
    %18 = vector.load %arg5[%c0_7, %c0_8, %c0_9] : memref<1x2x128xf32, #tpu.memory_space<vmem>>, vector<1x2x128xf32>
    tpu.vector_store %arg5[%c0_7, %c0_8, %c0_9], %17 {strides = array<i32>} : memref<1x2x128xf32, #tpu.memory_space<vmem>>, vector<1x2x128xf32>,
    return
  }
  func.func @transform_0(%arg0: i32, %arg1: i32) -> (i32, i32, i32) {
    %c0_i32 = arith.constant 0 : i32
    %c0_i32_0 = arith.constant 0 : i32
    return %arg1, %arg0, %c0_i32 : i32, i32, i32
  }
  func.func @transform_1(%arg0: i32, %arg1: i32) -> (i32, i32) {
    %c0_i32 = arith.constant 0 : i32
    %c0_i32_0 = arith.constant 0 : i32
    return %arg0, %c0_i32 : i32, i32
  }
  func.func @transform_2(%arg0: i32, %arg1: i32) -> (i32, i32) {
    %c0_i32 = arith.constant 0 : i32
    %c0_i32_0 = arith.constant 0 : i32
    return %arg0, %c0_i32 : i32, i32
  }
  func.func @transform_3(%arg0: i32, %arg1: i32) -> (i32, i32, i32) {
    %c0_i32 = arith.constant 0 : i32
    %c0_i32_0 = arith.constant 0 : i32
    return %arg1, %arg0, %c0_i32 : i32, i32, i32
  }
}

</mosaic_0001>

<bundles_post_ra>
// kernel: rope_forward.1
= control target key start
LH: loop header
LB: loop body
LE: loop exit
PB: predicated region body
PF: predicated region fallthrough
CT: control target
= control target key end

     0   :  { %s437_s12 = smov 0   ;;  %s439_s13 = smov 0   ;;  %s476_s0 = inlined_call_operand.vmem [shape: f32[2,2,128], index: 0, kind: input, shape index: {}]   ;;  %s477_s1 = inlined_call_operand.vmem [shape: f32[2,128], index: 1, kind: input, shape index: {}]   ;;  %s478_s2 = inlined_call_operand.vmem [shape: f32[2,128], index: 2, kind: input, shape index: {}]   ;;  %s479_s3 = inlined_call_operand.vmem [shape: f32[2,2,128], index: 3, kind: output, shape index: {}]  }
   0x1   :  { %s441_s14 = smov 0  }
   0x2 LB: > { %s22_s15 = sadd.s32 1, %s409_s13  ;;  %p360_p0 = scmp.ge.s32.totalorder %s413_s14, 1  ;;  %s413_s14 = sphi %s441_s14, %s13_s14   ;;  %s409_s13 = sphi %s439_s13, %s481_s13   ;;  %s405_s12 = sphi %s437_s12, %s480_s12  }
   0x3   : > { %p23_p1 = scmp.ge.s32.totalorder %s22_s15, 2  ;;  %p173_p2 = scmp.lt.s32.totalorder %s413_s14, 3 }
   0x5   : > { %s483_s15 = smov (%p23_p1, %s22_s15), 0  ;;  %p174_p3 = pnand %p360_p0, %p173_p2 }
   0x6   : > { %p209_p4 = scmp.lt.s32.totalorder (!%p174_p3), %s405_s12, 1  ;;  %s415_s20 = smov (!%p174_p3), 127   ;;  %v238_v1 = vlaneseq (!%p174_p3)  ;;  %v232_v5 = vld [vmem:[%s477_s1] sm:$0x3] (!%p174_p3) }
   0x7   : > { %177 = sbr.rel (%p174_p3) target bundleno = 143 (0x8f), region = 32  ;;  %s416_s21 = smov (!%p174_p3), 1   ;;  %v233_v6 = vld [vmem:[%s478_s2] sm:$0x3] (!%p174_p3) }
   0x8   : > { %v239_v2 = vand.u32 (!%p174_p3), 127, %v238_v1 }
   0xa   : > { %v240_v3 = vand.u32 (!%p174_p3), 1, %v239_v2 }
   0xc   : > { %vm241_vm0 = vcmp.eq.s32.totalorder (!%p174_p3), %v240_v3, 0 }
   0xe   : > { %s485_s12 = smov (!%p209_p4, %s405_s12), 1 }
   0xf   : > { %s361_s16 = sshll.u32 %s485_s12, 1 }
  0x10   : > { %s215_s19 = scalar_lea.vmem %s476_s0, %s361_s16  ;;  %s230_s28 = scalar_lea.vmem %s479_s3, %s361_s16 }
  0x11   : > { %v231_v0 = vld [vmem:[%s215_s19] sm:$0x3] }
  0x12   : > { %234 = vrot.lane.b32.xlu0 %v231_v0, %s415_s20  ;;  %v245_v7 = vmul.f32 %v232_v5, %v231_v0 }
  0x16   : > { %236 = vrot.lane.b32.xlu0 %v231_v0, %s416_s21 }
  0x84   : > { %v235_v4 = vpop.permute.xlu0 %234 }
  0x88   : > { %v237_v8 = vpop.permute.xlu0 %236 }
  0x89   : > { %v244_v9 = vsel %vm241_vm0, %v235_v4, %v237_v8 }
  0x8a   : > { %v246_v10 = vmul.f32 %v244_v9, %v233_v6 }
  0x8c   : > { %v247_v11 = vadd.f32 %v246_v10, %v245_v7 }
  0x8e   : > { %248 = vst [vmem:[%s230_s28] sm:$0x3] %v247_v11 }
  0x8f PF: > { %s13_s14 = sadd.s32 1, %s413_s14   ;;  %s480_s12 = smov %s409_s13 }
  0x90   : > { %p10_p5 = scmp.ge.s32.totalorder %s13_s14, 4   ;;  %s481_s13 = smov %s483_s15 }
  0x92   :  { %12 = sbr.rel (!%p10_p5) target bundleno = 2 (0x2), region = 68 }

</bundles_post_ra>
